<compile_context>
chip_gen: v7x
topology: tpu7x:2x2x1
jax: 0.10.0
libtpu: 0.0.40
codegen_flags: <defaults>
</compile_context>

<pallas_src>
import functools

import jax
import jax.numpy as jnp
from jax.experimental import pallas as pl
from jax.experimental.pallas import tpu as pltpu


def _round_up(x, m):
    return (x + m - 1) // m * m


def _tds_kernel(xa_ref, xh_ref, w_ref, bias_ref, gamma_ref, beta_ref, out_ref,
                xcat_ref, *, kw, n_batch, feat, eps, compute_dtype):
    tm = out_ref.shape[0]                 # rows per tile (static)
    overlap = (kw - 1) * n_batch          # halo rows needed from the next tile (static)

    if overlap > 0:
        # Splice current tile + the small halo into contiguous VMEM scratch so every conv
        # tap is a simple shifted (tm, C) slice of one buffer (works for any batch N).
        xcat_ref[pl.ds(0, tm), :] = xa_ref[...]
        xcat_ref[pl.ds(tm, overlap), :] = xh_ref[pl.ds(0, overlap), :]

        def tap(k):
            return xcat_ref[pl.ds(k * n_batch, tm), :]
    else:

        def tap(k):
            return xa_ref[...]

    # --- temporal conv: kw accumulating MXU dots (no (tm, kw*C) concatenate temporary) ---
    acc = jnp.dot(tap(0).astype(compute_dtype), w_ref[pl.ds(0, feat), :],
                  preferred_element_type=jnp.float32)
    for k in range(1, kw):
        acc = acc + jnp.dot(tap(k).astype(compute_dtype),
                            w_ref[pl.ds(k * feat, feat), :],
                            preferred_element_type=jnp.float32)
    acc = acc + bias_ref[...].astype(jnp.float32)

    # --- ReLU ---
    acc = jnp.maximum(acc, 0.0)

    # --- residual: inputs[-T_out:] for this row tile == the last conv tap (input precision) ---
    y = acc + tap(kw - 1).astype(jnp.float32)

    # --- LayerNorm over features: one-pass sum / sum-of-squares statistics (f32) ---
    inv_c = 1.0 / feat
    mean = jnp.sum(y, axis=-1, keepdims=True) * inv_c
    var = jnp.sum(y * y, axis=-1, keepdims=True) * inv_c - mean * mean
    var = jnp.maximum(var, 0.0)
    y_hat = (y - mean) * jax.lax.rsqrt(var + eps)
    out = y_hat * gamma_ref[...].astype(jnp.float32) + beta_ref[...].astype(jnp.float32)
    out_ref[...] = out.astype(out_ref.dtype)


def tds_conv2d_block(inputs, conv_w, conv_b, ln_gamma, ln_beta, *, channels, width,
                     eps=1e-5, block_rows=2048, compute_dtype=None):
    """Pallas TDSConv2dBlock.forward.

    inputs  : (T_in, N, C), C == channels * width
    conv_w  : (channels, channels, 1, kernel_width)   (PyTorch Conv2d weight layout)
    conv_b  : (channels,)
    ln_gamma, ln_beta : (C,)
    block_rows : target rows (= time*batch) per grid step.
    compute_dtype : dtype of the MXU matmul operands. Defaults to bfloat16 when inputs are
                    f32 (f32 accumulation / epilogue), otherwise the input dtype.
    returns : (T_out, N, C), T_out = T_in - kernel_width + 1
    """
    T_in, N, C = inputs.shape
    assert C == channels * width
    kw = conv_w.shape[-1]
    T_out = T_in - kw + 1
    assert T_out >= 1
    rows = T_out * N
    rows_in = T_in * N                    # == rows + overlap
    overlap = (kw - 1) * N
    overlap_pad = _round_up(overlap, 8) if overlap > 0 else 8

    if compute_dtype is None:
        compute_dtype = jnp.bfloat16 if inputs.dtype == jnp.float32 else inputs.dtype
    in_item = jnp.dtype(inputs.dtype).itemsize
    w_item = jnp.dtype(compute_dtype).itemsize

    # ---- generation-aware VMEM budget (64 MiB fallback == v7x per-core VMEM) ----
    try:
        vmem_cap = int(pltpu.get_tpu_info().vmem_capacity_bytes)
    except Exception:
        vmem_cap = 64 * 1024 * 1024
    vmem_budget = (vmem_cap * 3) // 4

    def vmem_estimate(tm_):
        return (2 * tm_ * C * in_item               # current tile, double-buffered
                + 2 * overlap_pad * C * in_item     # halo tile, double-buffered
                + 2 * tm_ * C * in_item             # output tile, double-buffered
                + kw * C * C * w_item               # resident fused conv weight
                + 3 * 8 * C * 4                     # bias / gamma / beta
                + (tm_ + overlap_pad) * C * in_item           # splice scratch
                + tm_ * C * (4 * 4 + kw * w_item))            # f32 intermediates + casts

    # ---- pick the row-tile size tm ----
    # tm must be a multiple of the halo block height so the halo element offset (i+1)*tm
    # is expressible as a block index of the (overlap_pad, C) halo BlockSpec.
    u = overlap_pad if overlap > 0 else 8
    tm = max(u, _round_up(min(block_rows, rows), u))
    tm = min(tm, max(u, _round_up(pl.cdiv(rows, 2), u)))   # keep >= 2 tiles (v7x has 2 TCs)
    while tm > u and vmem_estimate(tm) > vmem_budget:
        tm -= u
    # Prefer a divisor of `rows` (no ragged tail), but never shrink below tm/2 for it:
    # ragged tails are cheap now (partial edge blocks, no jnp.pad HBM copy).
    for cand in range(tm, max(u, tm // 2) - 1, -u):
        if rows % cand == 0:
            tm = cand
            break
    n_tiles = pl.cdiv(rows, tm)

    # ---- parameter glue (plain JAX, tiny) ----
    # (1, kw) conv over the (channels, width) feature grid == dense matmul on the flattened
    # feature axis with per-tap matrices kron(W_k^T, I_width), stacked along the K axis.
    # NOTE: for very large `width` this inflates MXU FLOPs by `width`; bf16 operands keep it
    # comfortably hidden under the HBM DMA on all generations.
    w = conv_w[:, :, 0, :]                                        # (co, ci, kw)
    eye_w = jnp.eye(width, dtype=jnp.float32)
    wflat = jnp.einsum("oik,uv->kiuov", w.astype(jnp.float32), eye_w)
    wflat = wflat.reshape(kw * C, C).astype(compute_dtype)        # (kw*C, C)
    bias_full = jnp.repeat(conv_b, width)[None, :].astype(jnp.float32)   # (1, C)
    gamma2 = ln_gamma[None, :].astype(jnp.float32)
    beta2 = ln_beta[None, :].astype(jnp.float32)

    # ---- flatten rows (free reshape); NO padding copies ----
    x2d = inputs.reshape(rows_in, C)

    # ---- halo BlockSpec: only overlap_pad rows starting at element offset (i+1)*tm ----
    if overlap > 0:
        bpt = tm // overlap_pad                       # halo blocks per row tile
        hmax = pl.cdiv(rows_in, overlap_pad) - 1      # last valid halo block index
        # Clamp: whenever the un-clamped block would start past the array end, its data is
        # provably unused (the needed halo rows already live in the current tile), so the
        # clamp only ever redirects dead reads to an in-range block.
        halo_index_map = lambda i: (jnp.minimum((i + 1) * bpt, hmax), 0)
    else:
        halo_index_map = lambda i: (0, 0)

    # ---- cost / VMEM hints ----
    flops = 2 * n_tiles * tm * (kw * C) * C
    bytes_accessed = (rows_in * C * in_item + rows * C * in_item
                      + n_tiles * overlap_pad * C * in_item
                      + kw * C * C * w_item + 3 * C * 4)
    cost = pl.CostEstimate(flops=int(flops), transcendentals=int(rows),
                           bytes_accessed=int(bytes_accessed))
    vmem_limit = int(min(vmem_budget, max(32 * 1024 * 1024, (vmem_estimate(tm) * 3) // 2)))

    out2d = pl.pallas_call(
        functools.partial(_tds_kernel, kw=kw, n_batch=N, feat=C, eps=eps,
                          compute_dtype=compute_dtype),
        out_shape=jax.ShapeDtypeStruct((rows, C), inputs.dtype),
        grid=(n_tiles,),
        in_specs=[
            pl.BlockSpec((tm, C), lambda i: (i, 0)),          # current row tile
            pl.BlockSpec((overlap_pad, C), halo_index_map),   # small temporal halo
            pl.BlockSpec((kw * C, C), lambda i: (0, 0)),      # fused conv weight (resident)
            pl.BlockSpec((1, C), lambda i: (0, 0)),           # bias
            pl.BlockSpec((1, C), lambda i: (0, 0)),           # gamma
            pl.BlockSpec((1, C), lambda i: (0, 0)),           # beta
        ],
        out_specs=pl.BlockSpec((tm, C), lambda i: (i, 0)),
        scratch_shapes=[pltpu.VMEM((tm + overlap_pad, C), inputs.dtype)],
        compiler_params=pltpu.CompilerParams(
            dimension_semantics=("parallel",),
            vmem_limit_bytes=vmem_limit),
        cost_estimate=cost,
    )(x2d, x2d, wflat, bias_full, gamma2, beta2)

    return out2d.reshape(T_out, N, C)


def _reference(inputs, conv_w, conv_b, ln_gamma, ln_beta, *, channels, width, eps=1e-5):
    """Pure-JAX transcription of the PyTorch forward (sanity check only)."""
    T_in, N, C = inputs.shape
    kw = conv_w.shape[-1]
    T_out = T_in - kw + 1
    x = jnp.moveaxis(inputs, 0, -1).reshape(N, channels, width, T_in)
    w = conv_w[:, :, 0, :]                                   # (co, ci, kw)
    xs = jnp.stack([x[..., k:k + T_out] for k in range(kw)], axis=-1)  # (N,ci,u,T_out,kw)
    conv = jnp.einsum("oik,niutk->nout", w, xs) + conv_b[None, :, None, None]
    conv = jnp.maximum(conv, 0.0)
    y = jnp.moveaxis(conv.reshape(N, C, T_out), -1, 0)       # (T_out, N, C)
    y = y + inputs[-T_out:]
    mean = y.mean(-1, keepdims=True)
    var = ((y - mean) ** 2).mean(-1, keepdims=True)
    return (y - mean) / jnp.sqrt(var + eps) * ln_gamma + ln_beta


if __name__ == "__main__":
    # channels * width = 128 -> lane-dense feature axis (multiple of 128).
    channels, width, kernel_width = 4, 32, 3
    T_in, N = 34, 2
    C = channels * width

    key = jax.random.PRNGKey(0)
    k_x, k_w, k_b, k_g, k_be = jax.random.split(key, 5)

    inputs = jax.random.normal(k_x, (T_in, N, C), dtype=jnp.float32)
    fan_in = channels * kernel_width
    conv_w = jax.random.normal(
        k_w, (channels, channels, 1, kernel_width), jnp.float32) / jnp.sqrt(fan_in)
    conv_b = 0.1 * jax.random.normal(k_b, (channels,), jnp.float32)
    ln_gamma = 1.0 + 0.1 * jax.random.normal(k_g, (C,), jnp.float32)
    ln_beta = 0.1 * jax.random.normal(k_be, (C,), jnp.float32)

    # block_rows=32 -> 2 row tiles (exercises the tiled / pipelined / small-halo path).
    out = tds_conv2d_block(inputs, conv_w, conv_b, ln_gamma, ln_beta,
                           channels=channels, width=width, block_rows=32)
    out = jax.block_until_ready(out)

    ref = _reference(inputs, conv_w, conv_b, ln_gamma, ln_beta,
                     channels=channels, width=width)
    assert out.shape == (T_in - kernel_width + 1, N, C)
    assert jnp.allclose(out, ref, atol=2e-2, rtol=2e-2)

    print("KERNEL_OK")
</pallas_src>

<mosaic_0001>
module attributes {stable_mosaic.version = 11 : i64} {
  func.func @_tds_kernel(%arg0: i32, %arg1: memref<32x128xf32, #tpu.memory_space<vmem>>, %arg2: memref<8x128xf32, #tpu.memory_space<vmem>>, %arg3: memref<384x128xbf16, #tpu.memory_space<vmem>>, %arg4: memref<1x128xf32, #tpu.memory_space<vmem>>, %arg5: memref<1x128xf32, #tpu.memory_space<vmem>>, %arg6: memref<1x128xf32, #tpu.memory_space<vmem>>, %arg7: memref<32x128xf32, #tpu.memory_space<vmem>>, %arg8: memref<40x128xf32, #tpu.memory_space<vmem>>) attributes {dimension_semantics = [#tpu.dimension_semantics<parallel>], iteration_bounds = array<i64: 2>, scalar_prefetch = 0 : i64, scratch_operands = 1 : i64, tpu.core_type = #tpu.core_type<tc>, window_params = [{transform_indices = @transform_0, window_bounds = array<i64: 32, 128>}, {transform_indices = @transform_1, window_bounds = array<i64: 8, 128>}, {pipeline_mode = #tpu.pipeline_mode<synchronous>, transform_indices = @transform_2, window_bounds = array<i64: 384, 128>}, {pipeline_mode = #tpu.pipeline_mode<synchronous>, transform_indices = @transform_3, window_bounds = array<i64: 1, 128>}, {pipeline_mode = #tpu.pipeline_mode<synchronous>, transform_indices = @transform_4, window_bounds = array<i64: 1, 128>}, {pipeline_mode = #tpu.pipeline_mode<synchronous>, transform_indices = @transform_5, window_bounds = array<i64: 1, 128>}, {transform_indices = @transform_6, window_bounds = array<i64: 32, 128>}]} {
    %c0 = arith.constant 0 : index
    %c0_0 = arith.constant 0 : index
    %0 = vector.load %arg1[%c0, %c0_0] : memref<32x128xf32, #tpu.memory_space<vmem>>, vector<32x128xf32>
    %c0_1 = arith.constant 0 : index
    %c0_2 = arith.constant 0 : index
    %1 = vector.load %arg8[%c0_1, %c0_2] : memref<40x128xf32, #tpu.memory_space<vmem>>, vector<32x128xf32>
    tpu.vector_store %arg8[%c0_1, %c0_2], %0 {strides = array<i32>} : memref<40x128xf32, #tpu.memory_space<vmem>>, vector<32x128xf32>,
    %c0_3 = arith.constant 0 : index
    %c0_4 = arith.constant 0 : index
    %2 = vector.load %arg2[%c0_3, %c0_4] : memref<8x128xf32, #tpu.memory_space<vmem>>, vector<4x128xf32>
    %c32 = arith.constant 32 : index
    %c0_5 = arith.constant 0 : index
    %3 = vector.load %arg8[%c32, %c0_5] : memref<40x128xf32, #tpu.memory_space<vmem>>, vector<4x128xf32>
    tpu.vector_store %arg8[%c32, %c0_5], %2 {strides = array<i32>} : memref<40x128xf32, #tpu.memory_space<vmem>>, vector<4x128xf32>,
    %c0_6 = arith.constant 0 : index
    %c0_7 = arith.constant 0 : index
    %4 = vector.load %arg8[%c0_6, %c0_7] : memref<40x128xf32, #tpu.memory_space<vmem>>, vector<32x128xf32>
    %5 = arith.truncf %4 : vector<32x128xf32> to vector<32x128xbf16>
    %c0_8 = arith.constant 0 : index
    %c0_9 = arith.constant 0 : index
    %6 = vector.load %arg3[%c0_8, %c0_9] : memref<384x128xbf16, #tpu.memory_space<vmem>>, vector<128x128xbf16>
    %cst = arith.constant dense<0.000000e+00> : vector<32x128xf32>
    %7 = tpu.matmul %5, %6, %cst {dimension_numbers = #tpu.dot_dimension_numbers<[1], [0], [0], [1], [0, 0, 1, 1], [], []>} : vector<32x128xbf16>, vector<128x128xbf16>, vector<32x128xf32> -> vector<32x128xf32>
    %c2 = arith.constant 2 : index
    %c0_10 = arith.constant 0 : index
    %8 = vector.load %arg8[%c2, %c0_10] : memref<40x128xf32, #tpu.memory_space<vmem>>, vector<32x128xf32>
    %9 = arith.truncf %8 : vector<32x128xf32> to vector<32x128xbf16>
    %c128 = arith.constant 128 : index
    %c0_11 = arith.constant 0 : index
    %10 = vector.load %arg3[%c128, %c0_11] : memref<384x128xbf16, #tpu.memory_space<vmem>>, vector<128x128xbf16>
    %cst_12 = arith.constant dense<0.000000e+00> : vector<32x128xf32>
    %11 = tpu.matmul %9, %10, %cst_12 {dimension_numbers = #tpu.dot_dimension_numbers<[1], [0], [0], [1], [0, 0, 1, 1], [], []>} : vector<32x128xbf16>, vector<128x128xbf16>, vector<32x128xf32> -> vector<32x128xf32>
    %12 = arith.addf %7, %11 : vector<32x128xf32>
    %c4 = arith.constant 4 : index
    %c0_13 = arith.constant 0 : index
    %13 = vector.load %arg8[%c4, %c0_13] : memref<40x128xf32, #tpu.memory_space<vmem>>, vector<32x128xf32>
    %14 = arith.truncf %13 : vector<32x128xf32> to vector<32x128xbf16>
    %c256 = arith.constant 256 : index
    %c0_14 = arith.constant 0 : index
    %15 = vector.load %arg3[%c256, %c0_14] : memref<384x128xbf16, #tpu.memory_space<vmem>>, vector<128x128xbf16>
    %cst_15 = arith.constant dense<0.000000e+00> : vector<32x128xf32>
    %16 = tpu.matmul %14, %15, %cst_15 {dimension_numbers = #tpu.dot_dimension_numbers<[1], [0], [0], [1], [0, 0, 1, 1], [], []>} : vector<32x128xbf16>, vector<128x128xbf16>, vector<32x128xf32> -> vector<32x128xf32>
    %17 = arith.addf %12, %16 : vector<32x128xf32>
    %c0_16 = arith.constant 0 : index
    %c0_17 = arith.constant 0 : index
    %18 = vector.load %arg4[%c0_16, %c0_17] : memref<1x128xf32, #tpu.memory_space<vmem>>, vector<1x128xf32>
    %19 = vector.broadcast %18 : vector<1x128xf32> to vector<32x128xf32>
    %20 = arith.addf %17, %19 : vector<32x128xf32>
    %cst_18 = arith.constant 0.000000e+00 : f32
    %21 = vector.broadcast %cst_18 : f32 to vector<32x128xf32>
    %22 = arith.maximumf %20, %21 : vector<32x128xf32>
    %c4_19 = arith.constant 4 : index
    %c0_20 = arith.constant 0 : index
    %23 = vector.load %arg8[%c4_19, %c0_20] : memref<40x128xf32, #tpu.memory_space<vmem>>, vector<32x128xf32>
    %24 = arith.addf %22, %23 : vector<32x128xf32>
    %cst_21 = arith.constant dense<0.000000e+00> : vector<32xf32>
    %25 = vector.multi_reduction <add>, %24, %cst_21 [1] : vector<32x128xf32> to vector<32xf32>
    %26 = vector.shape_cast %25 : vector<32xf32> to vector<32x1xf32>
    %cst_22 = arith.constant 7.812500e-03 : f32
    %27 = vector.broadcast %cst_22 : f32 to vector<32x1xf32>
    %28 = arith.mulf %26, %27 : vector<32x1xf32>
    %29 = arith.mulf %24, %24 : vector<32x128xf32>
    %cst_23 = arith.constant dense<0.000000e+00> : vector<32xf32>
    %30 = vector.multi_reduction <add>, %29, %cst_23 [1] : vector<32x128xf32> to vector<32xf32>
    %31 = vector.shape_cast %30 : vector<32xf32> to vector<32x1xf32>
    %cst_24 = arith.constant 7.812500e-03 : f32
    %32 = vector.broadcast %cst_24 : f32 to vector<32x1xf32>
    %33 = arith.mulf %31, %32 : vector<32x1xf32>
    %34 = arith.mulf %28, %28 : vector<32x1xf32>
    %35 = arith.subf %33, %34 : vector<32x1xf32>
    %cst_25 = arith.constant 0.000000e+00 : f32
    %36 = vector.broadcast %cst_25 : f32 to vector<32x1xf32>
    %37 = arith.maximumf %35, %36 : vector<32x1xf32>
    %38 = vector.broadcast %28 : vector<32x1xf32> to vector<32x128xf32>
    %39 = arith.subf %24, %38 : vector<32x128xf32>
    %cst_26 = arith.constant 9.99999974E-6 : f32
    %40 = vector.broadcast %cst_26 : f32 to vector<32x1xf32>
    %41 = arith.addf %37, %40 : vector<32x1xf32>
    %42 = math.rsqrt %41 : vector<32x1xf32>
    %43 = vector.broadcast %42 : vector<32x1xf32> to vector<32x128xf32>
    %44 = arith.mulf %39, %43 : vector<32x128xf32>
    %c0_27 = arith.constant 0 : index
    %c0_28 = arith.constant 0 : index
    %45 = vector.load %arg5[%c0_27, %c0_28] : memref<1x128xf32, #tpu.memory_space<vmem>>, vector<1x128xf32>
    %46 = vector.broadcast %45 : vector<1x128xf32> to vector<32x128xf32>
    %47 = arith.mulf %44, %46 : vector<32x128xf32>
    %c0_29 = arith.constant 0 : index
    %c0_30 = arith.constant 0 : index
    %48 = vector.load %arg6[%c0_29, %c0_30] : memref<1x128xf32, #tpu.memory_space<vmem>>, vector<1x128xf32>
    %49 = vector.broadcast %48 : vector<1x128xf32> to vector<32x128xf32>
    %50 = arith.addf %47, %49 : vector<32x128xf32>
    %c0_31 = arith.constant 0 : index
    %c0_32 = arith.constant 0 : index
    %51 = vector.load %arg7[%c0_31, %c0_32] : memref<32x128xf32, #tpu.memory_space<vmem>>, vector<32x128xf32>
    tpu.vector_store %arg7[%c0_31, %c0_32], %50 {strides = array<i32>} : memref<32x128xf32, #tpu.memory_space<vmem>>, vector<32x128xf32>,
    return
  }
  func.func @transform_0(%arg0: i32) -> (i32, i32) {
    %c0_i32 = arith.constant 0 : i32
    %c0_i32_0 = arith.constant 0 : i32
    return %arg0, %c0_i32 : i32, i32
  }
  func.func @transform_1(%arg0: i32) -> (i32, i32) {
    %c1_i32 = arith.constant 1 : i32
    %0 = arith.addi %arg0, %c1_i32 : i32
    %c4_i32 = arith.constant 4 : i32
    %1 = arith.muli %0, %c4_i32 : i32
    %c8_i32 = arith.constant 8 : i32
    %2 = arith.minsi %1, %c8_i32 : i32
    %c0_i32 = arith.constant 0 : i32
    %c0_i32_0 = arith.constant 0 : i32
    return %2, %c0_i32 : i32, i32
  }
  func.func @transform_2(%arg0: i32) -> (i32, i32) {
    %c0_i32 = arith.constant 0 : i32
    %c0_i32_0 = arith.constant 0 : i32
    %c0_i32_1 = arith.constant 0 : i32
    return %c0_i32, %c0_i32_0 : i32, i32
  }
  func.func @transform_3(%arg0: i32) -> (i32, i32) {
    %c0_i32 = arith.constant 0 : i32
    %c0_i32_0 = arith.constant 0 : i32
    %c0_i32_1 = arith.constant 0 : i32
    return %c0_i32, %c0_i32_0 : i32, i32
  }
  func.func @transform_4(%arg0: i32) -> (i32, i32) {
    %c0_i32 = arith.constant 0 : i32
    %c0_i32_0 = arith.constant 0 : i32
    %c0_i32_1 = arith.constant 0 : i32
    return %c0_i32, %c0_i32_0 : i32, i32
  }
  func.func @transform_5(%arg0: i32) -> (i32, i32) {
    %c0_i32 = arith.constant 0 : i32
    %c0_i32_0 = arith.constant 0 : i32
    %c0_i32_1 = arith.constant 0 : i32
    return %c0_i32, %c0_i32_0 : i32, i32
  }
  func.func @transform_6(%arg0: i32) -> (i32, i32) {
    %c0_i32 = arith.constant 0 : i32
    %c0_i32_0 = arith.constant 0 : i32
    return %arg0, %c0_i32 : i32, i32
  }
}

</mosaic_0001>

<bundles_post_ra>
// kernel: tpu_custom_call.1
= control target key start
LH: loop header
LB: loop body
LE: loop exit
PB: predicated region body
PF: predicated region fallthrough
CT: control target
= control target key end

     0   :  { %s1786_s0 = inlined_call_operand.hbm [shape: f32[68,128], index: 0, kind: input, shape index: {}]   ;;  %s1787_s1 = inlined_call_operand.hbm [shape: f32[68,128], index: 1, kind: input, shape index: {}]   ;;  %s1788_s2 = inlined_call_operand.hbm [shape: bf16[384,128], index: 2, kind: input, shape index: {}]   ;;  %s1789_s3 = inlined_call_operand.vmem [shape: f32[1,128], index: 3, kind: input, shape index: {}]   ;;  %s1790_s4 = inlined_call_operand.vmem [shape: f32[1,128], index: 4, kind: input, shape index: {}]   ;;  %s1791_s5 = inlined_call_operand.vmem [shape: f32[1,128], index: 5, kind: input, shape index: {}]   ;;  %s1792_s6 = inlined_call_operand.hbm [shape: f32[64,128], index: 6, kind: output, shape index: {}]  }
   0x1   :  { %1806 = sst [smem:[#allocation19_spill]] %s1786_s0 }
   0x2   :  { %1807 = sst [smem:[#allocation20_spill]] %s1788_s2 }
   0x3   :  { %11 = vsyncpa [#allocation4], 0 }
   0x4   :  { %13 = vsyncpa [#allocation4 + $0x1], 0 }
   0x5   :  { %14 = vsyncpa [#allocation7], 0 }
   0x6   :  { %16 = vsyncpa [#allocation7 + $0x1], 0 }
   0x7   :  { %17 = vsyncpa [#allocation5], 0 }
   0x8   :  { %19 = vsyncpa [#allocation5 + $0x1], 0  ;;  %s1446_s21 = smov 0   ;;  %s1448_s22 = smov 0  }
   0x9   :  { %s1450_s23 = smov 0   ;;  %s1452_s24 = smov 0  }
   0xa   :  { %s1454_s25 = smov 0   ;;  %s1456_s26 = smov 0  }
   0xb   :  { %s1458_s27 = smov 0  }
   0xc LB: > { %1808 = sst [smem:[#allocation14_spill]] %s1395_s26  ;;  %s1482_s28 = sadd.s32 4294967295, %s1399_s27   ;;  %s1399_s27 = sphi %s1458_s27, %s1836_s27   ;;  %s1395_s26 = sphi %s1456_s26, %s1839_s26   ;;  %s1391_s25 = sphi %s1454_s25, %s1844_s25   ;;  %s1387_s24 = sphi %s1452_s24, %s1843_s24   ;;  %s1383_s23 = sphi %s1450_s23, %s1842_s23   ;;  %s1379_s22 = sphi %s1448_s22, %s1841_s22   ;;  %s1375_s21 = sphi %s1446_s21, %s1840_s21  }
   0xd   : > { %s941_s29 = sadd.s32 4294967294, %s1399_s27   ;;  %s1486_s30 = sadd.s32 1, %s1399_s27  }
   0xe   : > { %1809 = sst [smem:[#allocation15_spill]] %s1486_s30  ;;  %s32_s7 = sadd.s32 1, %s1395_s26 }
   0xf   : > { %s29_s8 = ssub.s32 %s1399_s27, %s1486_s30  ;;  %p39_p0 = scmp.ne.s32.totalorder %s1395_s26, %s1391_s25 }
  0x10   : > { %p30_p1 = scmp.eq.s32.totalorder %s29_s8, 0  ;;  %p40_p2 = scmp.eq.s32.totalorder %s1399_s27, 0 }
  0x11   : > { %p1793_p3 = scmp.ne.s32.totalorder %s1391_s25, %s1387_s24  ;;  %p1800_p4 = scmp.eq.s32.totalorder %s1482_s28, 0 }
  0x12   : > { %s1498_s9 = scalar_select %p30_p1, %s1395_s26, %s32_s7  }
  0x13   : > { %p1505_p5 = por %p40_p2, %p39_p0  ;;  %p1514_p6 = por %p1800_p4, %p1793_p3 }
  0x14   : > { %1810 = sst [smem:[#allocation16_spill]] %s1498_s9  ;;  %s1796_s12 = sshll.u32 %s1399_s27, 2 }
  0x15   : > { %s1811_s10 = scalar_select %p1505_p5, 1, 0 }
  0x16   : > { %s1812_s11 = scalar_select %p1514_p6, 1, 0 }
  0x17   : > { %s66_s13 = sadd.s32 1, %s1383_s23  ;;  %s995_s14 = sadd.s32 4, %s1796_s12 }
  0x18   : > { %p73_p7 = scmp.ne.s32.totalorder %s1383_s23, %s1379_s22  ;;  %p57_p8 = scmp.lt.s32.totalorder %s995_s14, 8 }
  0x19   : > { %s997_s15 = sadd.s32 4, %s995_s14  ;;  %p79_p11 = scmp.ne.s32.totalorder %s1379_s22, %s1375_s21 }
  0x1a   : > { %p61_p9 = scmp.lt.s32.totalorder %s997_s15, 8  ;;  %p1526_p10 = por %p73_p7, %p40_p2 }
  0x1b   : > { %s1846_s14 = smov (!%p57_p8, %s995_s14), 8  ;;  %p187_p12 = scmp.eq.s32.totalorder %s1482_s28, 1 }
  0x1c   : > { %s1813_s16 = scalar_select %p1526_p10, 1, 0 }
  0x1d   : > { %s1848_s15 = smov (!%p61_p9, %s997_s15), 8  ;;  %p193_p13 = scmp.eq.s32.totalorder %s941_s29, 1 }
  0x1e   : > { %s63_s17 = ssub.s32 %s1846_s14, %s1848_s15  ;;  %p1538_p3 = por %p79_p11, %p1800_p4 }
  0x1f   : > { %p64_p1 = scmp.eq.s32.totalorder %s63_s17, 0  ;;  %p1545_p2 = por %p187_p12, %p39_p0 }
  0x20   : > { %s1814_s18 = scalar_select %p1538_p3, 1, 0 }
  0x21   : > { %s1815_s19 = scalar_select %p1545_p2, 1, 0 }
  0x22   : > { %p1816_p7 = scmp.ne.s32.totalorder %s1391_s25, %s1387_s24  ;;  %p944_p9 = scmp.ge.s32.totalorder %s1399_s27, 1 }
  0x23   : > { %s1557_s21 = scalar_select %p64_p1, %s1383_s23, %s66_s13  }
  0x24   : > { %p1552_p8 = por %p193_p13, %p1816_p7  ;;  %p200_p6 = scmp.lt.s32.totalorder %s1399_s27, 3 }
  0x25   : > { %1819 = sst [smem:[#allocation18_spill]] %s1557_s21  ;;  %s1401_s7 = smov [#allocation8]  }
  0x26   : > { %s1817_s20 = scalar_select %p1552_p8, 1, 0 }
  0x27   : > { %p1561_p10 = pnand %p944_p9, %p200_p6  ;;  %s212_s8 = sshll.u32 %s1401_s7, 4  ;;  %s213_s8 = int_to_ptr.vmem [resolvable:$true] %s212_s8 }
  0x28   : > { %1818 = sst [smem:[#allocation17_spill]] %s1817_s20  ;;  %s1822_s2 = sld [smem:[#allocation20_spill]] }
  0x29   : > { %s1820_s29 = scalar_select %p1561_p10, 1, 0 }
  0x2a   : > { %p1111_p0 = pneg %p1561_p10 }
  0x2c   : > { %p1569_p11 = pnand %p1111_p0, %p1800_p4 }
  0x2e   : > { %s1217_s12 = scalar_lea.hbm %s1822_s2, 3072  ;;  %p1219_p12 = pneg %p1569_p11 }
  0x2f   : > { %p1218_p6 = scmp.ne.s32.totalorder %s1822_s2, %s1217_s12  ;;  %p1224_p7 = scmp.lt.u32.totalorder %s1217_s12, %s1822_s2 }
  0x31   : > { %p1220_p13 = pnand %p1219_p12, %p1218_p6 }
  0x33   : > { %p1221_p1 = pneg %p1220_p13 }
  0x35   : > { %p1226_p9 = pnand %p1224_p7, %p1221_p1 }
  0x37   : > { %1229 = shalt.err (!%p1226_p9)
}
  0x38   : > { %s1230_s20 = scalar_lea.vmem %s213_s8, 3072  ;;  %p1238_p2 = scmp.lt.s32.totalorder %s213_s8, %s213_s8 }
  0x39   : > { %p1231_p0 = scmp.ne.s32.totalorder %s213_s8, %s1230_s20  ;;  %p1239_p3 = scmp.lt.s32.totalorder %s1230_s20, %s1230_s20 }
  0x3b   : > { %p1233_p4 = pnand %p1231_p0, %p1219_p12  ;;  %p1240_p10 = por %p1239_p3, %p1238_p2 }
  0x3d   : > { %p1234_p8 = pneg %p1233_p4 }
  0x3f   : > { %p1241_p5 = pnand %p1240_p10, %p1234_p8 }
  0x41   : > { %1244 = shalt.err (!%p1241_p5)
}
  0x42   : > { %s1402_s9 = smov 64   ;;  %s1403_s21 = smov 4  }
  0x43   : > { %1114 = dma.hbm_to_vmem [thread:$0]  (!%p1569_p11), %s1822_s2, 3072, %s213_s8, [#allocation7], %s1402_s9, %s1402_s9, %s1403_s21  }
  0x44   : > { %p1805_p6 = scmp.ge.s32.totalorder %s1399_s27, 2 }
  0x45   : > { %p1823_p4 = scmp.ne.s32.totalorder (!%p1805_p6), %s1811_s10, 0 }
  0x46   : > { %231 = sbr.rel (%p1805_p6) target bundleno = 143 (0x8f), region = 32 }
  0x4d   : > { %234 = sbr.rel (!%p1823_p4) target bundleno = 117 (0x75), region = 36  ;;  %s235_s30 = sand.u32 (%p1823_p4), 1, %s1395_s26  }
  0x4e   : > { %s1824_s12 = sshll.u32 (%p1823_p4), %s1399_s27, 2  ;;  %s947_s7 = sshll.u32 (%p1823_p4), %s235_s30, 5 }
  0x4f   : > { %s241_s20 = ssub.s32 (%p1823_p4), 9, %s1824_s12  ;;  %s1600_s9 = scalar_lea.sflag (%p1823_p4), [#allocation4], %s235_s30 }
  0x50   : > { %p242_p3 = scmp.lt.s32.totalorder (%p1823_p4), %s241_s20, 4  ;;  %s239_s21 = scalar_lea.vmem (%p1823_p4), [#allocation3], %s947_s7 }
  0x54   : > { %s1850_s20 = smov (!%p242_p3, %s241_s20), 4 }
  0x55   : > { %s1597_s15 = sshll.u32 %s1850_s20, 7 }
  0x56   : > { %s246_s8 = ssub.s32 512, %s1597_s15 }
  0x57   : > { %247 = vsyncadd %s1600_s9, %s246_s8  ;;  %p950_p5 = scmp.ne.s32.totalorder %s1597_s15, 0  ;;  %s998_s10 = sshll.u32 %s1399_s27, 9 }
  0x58   : > { %s1825_s0 = sld [smem:[#allocation19_spill]]  ;;  %s252_s30 = sshll.u32 %s239_s21, 4  ;;  %s1610_s30 = int_to_ptr.vmem [resolvable:$true] %s252_s30 }
  0x5e   : > { %s1608_s12 = scalar_lea.hbm %s1825_s0, %s998_s10  ;;  %s1249_s2 = scalar_lea.hbm %s1825_s0, 1152 }
  0x5f   : > { %s1245_s20 = scalar_lea.hbm %s1608_s12, %s1597_s15  ;;  %p1250_p11 = scmp.lt.u32.totalorder %s1608_s12, %s1825_s0 }
  0x60   : > { %p1246_p10 = scmp.ne.s32.totalorder %s1608_s12, %s1245_s20  ;;  %p1251_p12 = scmp.lt.u32.totalorder %s1249_s2, %s1245_s20 }
  0x61   : > { %p1253_p1 = scmp.lt.u32.totalorder %s1245_s20, %s1608_s12 }
  0x62   : > { %p1247_p2 = pnand %p1246_p10, %p950_p5  ;;  %p1252_p13 = por %p1251_p12, %p1250_p11 }
  0x64   : > { %p1248_p8 = pneg %p1247_p2  ;;  %p1254_p7 = por %p1253_p1, %p1252_p13 }
  0x66   : > { %p1255_p9 = pnand %p1254_p7, %p1248_p8 }
  0x68   : > { %1258 = shalt.err (!%p1255_p9)
}
  0x69   : > { %s1259_s21 = scalar_lea.vmem %s1610_s30, %s1597_s15  ;;  %s1404_s10 = smov [#allocation3]  }
  0x6a   : > { %p1260_p0 = scmp.ne.s32.totalorder %s1610_s30, %s1259_s21  ;;  %s1263_s13 = sshll.u32 %s1404_s10, 4  ;;  %s1264_s13 = int_to_ptr.vmem [resolvable:$false] %s1263_s13 }
  0x6b   : > { %s1265_s26 = scalar_lea.vmem %s1264_s13, 1024  ;;  %p1266_p10 = scmp.lt.s32.totalorder %s1610_s30, %s1264_s13 }
  0x6c   : > { %p1261_p4 = pnand %p1260_p0, %p950_p5  ;;  %p1267_p2 = scmp.lt.s32.totalorder %s1265_s26, %s1259_s21 }
  0x6e   : > { %p1262_p3 = pneg %p1261_p4  ;;  %p1268_p11 = por %p1267_p2, %p1266_p10 }
  0x70   : > { %p1269_p12 = pnand %p1268_p11, %p1262_p3 }
  0x72   : > { %1272 = shalt.err (!%p1269_p12)
}
  0x73   : > { %s1405_s2 = smov 128   ;;  %s1406_s20 = smov 8  }
  0x74   : > { %258 = dma.hbm_to_vmem [thread:$0]  (%p950_p5), %s1608_s12, %s1597_s15, %s1610_s30, %s1600_s9, %s1405_s2, %s1405_s2, %s1406_s20  }
  0x75 PF: > { %s262_s7 = sand.u32 1, %s1399_s27   ;;  %s264_s8 = sand.u32 1, %s1383_s23  }
  0x76   : > { %s954_s17 = sshll.u32 %s264_s8, 3  ;;  %s956_s21 = sshll.u32 %s1846_s14, 7 }
  0x77   : > { %s1643_s26 = scalar_lea.hbm %s1787_s1, %s956_s21  ;;  %s266_s0 = scalar_lea.vmem [#allocation6], %s954_s17 }
  0x78   : > { %s277_s15 = sshll.u32 %s266_s0, 4  ;;  %s263_s9 = scalar_lea.sflag [#allocation7], %s262_s7  ;;  %s278_s15 = int_to_ptr.vmem [resolvable:$true] %s277_s15 }
  0x79   : > { %s1273_s12 = scalar_lea.hbm %s1643_s26, 128  ;;  %p1826_p8 = scmp.ne.s32.totalorder %s1813_s16, 0 }
  0x7a   : > { %p1274_p5 = scmp.ne.s32.totalorder %s1643_s26, %s1273_s12  ;;  %s1277_s2 = scalar_lea.hbm %s1787_s1, 1152 }
  0x7b   : > { %p1278_p7 = scmp.lt.u32.totalorder %s1643_s26, %s1787_s1  ;;  %p1279_p9 = scmp.lt.u32.totalorder %s1277_s2, %s1273_s12 }
  0x7c   : > { %p1275_p13 = pnand %p1274_p5, %p1826_p8  ;;  %p1281_p4 = scmp.lt.u32.totalorder %s1273_s12, %s1643_s26 }
  0x7d   : > { %p1280_p0 = por %p1279_p9, %p1278_p7 }
  0x7e   : > { %p1276_p1 = pneg %p1275_p13 }
  0x7f   : > { %p1282_p3 = por %p1281_p4, %p1280_p0 }
  0x81   : > { %p1283_p10 = pnand %p1282_p3, %p1276_p1 }
  0x83   : > { %1286 = shalt.err (!%p1283_p10)
}
  0x84   : > { %s1287_s0 = scalar_lea.vmem %s278_s15, 128  ;;  %s1407_s7 = smov [#allocation6]  }
  0x85   : > { %p1288_p2 = scmp.ne.s32.totalorder %s278_s15, %s1287_s0  ;;  %s1291_s17 = sshll.u32 %s1407_s7, 4  ;;  %s1292_s17 = int_to_ptr.vmem [resolvable:$false] %s1291_s17 }
  0x86   : > { %s1293_s21 = scalar_lea.vmem %s1292_s17, 256  ;;  %p1294_p5 = scmp.lt.s32.totalorder %s278_s15, %s1292_s17 }
  0x87   : > { %p1289_p11 = pnand %p1288_p2, %p1826_p8  ;;  %p1295_p13 = scmp.lt.s32.totalorder %s1293_s21, %s1287_s0 }
  0x89   : > { %p1290_p12 = pneg %p1289_p11  ;;  %p1296_p6 = por %p1295_p13, %p1294_p5 }
  0x8b   : > { %p1297_p7 = pnand %p1296_p6, %p1290_p12 }
  0x8d   : > { %1300 = shalt.err (!%p1297_p7)
}
  0x8e   : > { %1104 = dma.hbm_to_vmem [thread:$0]  (%p1826_p8), %s1643_s26, 128, %s278_s15, %s263_s9  }
  0x8f PF: > { %p1827_p1 = scmp.ne.s32.totalorder %s1820_s29, 0 }
  0x90   : > { %s1665_s10 = sand.u32 (!%p1827_p1), 1, %s1391_s25   ;;  %p1828_p6 = scmp.ne.s32.totalorder (!%p1827_p1), %s1812_s11, 0 }
  0x91   : > { %286 = sbr.rel (%p1827_p1) target bundleno = 641 (0x281), region = 44  ;;  %s958_s13 = sshll.u32 (!%p1827_p1), %s1665_s10, 5 }
  0x92   : > { %s289_s12 = scalar_lea.sflag (!%p1827_p1), [#allocation4], %s1665_s10  ;;  %s1671_s30 = scalar_lea.vmem (!%p1827_p1), [#allocation3], %s958_s13 }
  0x98   : > { %1358 = dma.done.wait (%p1828_p6), %s289_s12, 512  }
  0x99   : > { %1360 = vsyncadd (%p1828_p6), %s289_s12, 4294966784  ;;  %s297_s16 = sand.u32 1, %s1482_s28   ;;  %s299_s29 = sand.u32 1, %s1379_s22  }
  0x9a   : > { %s1679_s26 = sshll.u32 %s299_s29, 3  ;;  %s298_s15 = scalar_lea.sflag [#allocation7], %s297_s16 }
  0x9b   : > { %s301_s9 = scalar_lea.vmem [#allocation6], %s1679_s26  ;;  %p1829_p8 = scmp.ne.s32.totalorder %s1814_s18, 0 }
  0x9d   : > { %1362 = dma.done.wait (%p1829_p8), %s298_s15, 128  }
  0x9e   : > { %1364 = vsyncadd (%p1829_p8), %s298_s15, 4294967168  ;;  %p1830_p9 = scmp.eq.s32.totalorder %s1482_s28, 0 }
  0xa0   : > { %1366 = dma.done.wait (%p1830_p9), [#allocation7], 3072   ;;  %p1831_p0 = pmov %p1830_p9 }
  0xa1   : > { %v1185_v0 = vld [vmem:[#allocation8] sm:$0xff]   ;;  %v1186_v1 = vld [vmem:[#allocation8 + $0x8] sm:$0xff]   ;;  %v1187_v2 = vld [vmem:[#allocation8 + $0x10] sm:$0xff]   ;;  %s1001_s0 = sshll.u32 %s1482_s28, 9  ;;  %s338_s7 = scalar_lea.vmem [#allocation9], %s958_s13 }
  0xa2   : > { %1368 = vsyncadd (%p1831_p0), [#allocation7], 4294964224  ;;  %1054 = vmatprep.subr.bf16.mxu0 %v1185_v0  ;;  %v1188_v3 = vld [vmem:[#allocation8 + $0x18] sm:$0xff]   ;;  %v1193_v4 = vld [vmem:[#allocation8 + $0x40] sm:$0xff]   ;;  %s836_s17 = sshll.u32 %s338_s7, 4  ;;  %s823_s28 = scalar_lea.sflag [#allocation5], %s1665_s10  ;;  %s1733_s17 = int_to_ptr.vmem [resolvable:$true] %s836_s17 }
  0xa3   : > { %1055 = vmatpush3.bf16.msra.mxu0 %v1185_v0  ;;  %v350_v5 = vld [vmem:[%s1671_s30] sm:$0xff]  ;;  %v351_v6 = vld [vmem:[%s1671_s30 + $0x8] sm:$0xff]  ;;  %v1189_v7 = vld [vmem:[#allocation8 + $0x20] sm:$0xff]   ;;  %1034 = vmatprep.subr.bf16.mxu1 %v1193_v4  ;;  %s1301_s13 = scalar_lea.vmem %s1733_s17, 512  ;;  %p1832_p3 = scmp.ne.s32.totalorder %s1815_s19, 0 }
  0xa4   : > { %1056 = vmatprep.subr.bf16.mxu0 %v1186_v1  ;;  %354 = vst [vmem:[#allocation2] sm:$0xff] %v350_v5  ;;  %355 = vst [vmem:[#allocation2 + $0x8] sm:$0xff] %v351_v6  ;;  %v364_v8 = vpack.c.bf16 %v351_v6, %v350_v5  ;;  %1035 = vmatpush3.bf16.msra.mxu1 %v1193_v4  ;;  %v1195_v9 = vld [vmem:[#allocation8 + $0x48] sm:$0xff]   ;;  %v352_v10 = vld [vmem:[%s1671_s30 + $0x10] sm:$0xff]  ;;  %p1302_p4 = scmp.ne.s32.totalorder %s1733_s17, %s1301_s13  ;;  %s1408_s16 = smov [#allocation9]  }
  0xa5   : > { %v353_v11 = vld [vmem:[%s1671_s30 + $0x18] sm:$0xff]  ;;  %356 = vst [vmem:[#allocation2 + $0x10] sm:$0xff] %v352_v10  ;;  %1036 = vmatprep.subr.bf16.mxu1 %v1195_v9  ;;  %v1197_v12 = vld [vmem:[#allocation8 + $0x50] sm:$0xff]   ;;  %v1199_v14 = vld [vmem:[#allocation8 + $0x58] sm:$0xff]   ;;  %s1731_s30 = scalar_lea.hbm %s1792_s6, %s1001_s0  ;;  %s1305_s29 = sshll.u32 %s1408_s16, 4  ;;  %s1306_s29 = int_to_ptr.vmem [resolvable:$false] %s1305_s29 }
  0xa6   : > { %1070 = vmatprep.mubr.bf16.mxu0 %v364_v8  ;;  %357 = vst [vmem:[#allocation2 + $0x18] sm:$0xff] %v353_v11  ;;  %v1190_v13 = vld [vmem:[#allocation8 + $0x28] sm:$0xff]   ;;  %v1191_v15 = vld [vmem:[#allocation8 + $0x30] sm:$0xff]   ;;  %v1201_v16 = vld [vmem:[#allocation8 + $0x60] sm:$0xff]   ;;  %v365_v25 = vpack.c.bf16 %v353_v11, %v352_v10  ;;  %p1303_p10 = pnand %p1302_p4, %p1832_p3  ;;  %s1307_s26 = scalar_lea.vmem %s1306_s29, 1024 }
  0xa7   : > { %1057 = vmatpush3.bf16.msra.mxu0 %v1186_v1  ;;  %v1192_v17 = vld [vmem:[#allocation8 + $0x38] sm:$0xff]   ;;  %v1203_v18 = vld [vmem:[#allocation8 + $0x68] sm:$0xff]   ;;  %v1194_v23 = vld [vmem:[#allocation8 + $0x80] sm:$0xff]   ;;  %p1308_p11 = scmp.lt.s32.totalorder %s1733_s17, %s1306_s29  ;;  %p1309_p12 = scmp.lt.s32.totalorder %s1307_s26, %s1301_s13 }
  0xa8   : > { %1058 = vmatprep.subr.bf16.mxu0 %v1187_v2  ;;  %1037 = vmatpush3.bf16.msra.mxu1 %v1195_v9  ;;  %v358_v22 = vld [vmem:[%s301_s9] sm:$0xf]  ;;  %v1196_v28 = vld [vmem:[#allocation8 + $0x88] sm:$0xff]   ;;  %v1202_v36 = vld [vmem:[#allocation8 + $0xa0] sm:$0xff]   ;;  %p1304_p2 = pneg %p1303_p10 }
  0xa9   : > { %1038 = vmatprep.subr.bf16.mxu1 %v1197_v12  ;;  %359 = vst [vmem:[#allocation2 + $0x20] sm:$0xf] %v358_v22  ;;  %v1205_v24 = vld [vmem:[#allocation8 + $0x70] sm:$0xff]   ;;  %v1207_v29 = vld [vmem:[#allocation8 + $0x78] sm:$0xff]   ;;  %v1204_v37 = vld [vmem:[#allocation8 + $0xa8] sm:$0xff]   ;;  %p1310_p5 = por %p1309_p12, %p1308_p11 }
  0xaa   : > { %v1198_v33 = vld [vmem:[#allocation8 + $0x90] sm:$0xff]   ;;  %v1200_v35 = vld [vmem:[#allocation8 + $0x98] sm:$0xff]   ;;  %v986_v48 = vld [vmem:[%s1789_s3] ss:$0 sm:$0xff] }
  0xab   : > { %1059 = vmatpush3.bf16.msra.mxu0 %v1187_v2  ;;  %v382_v19 = vld [vmem:[#allocation2 + $0x2] sm:$0xff]  ;;  %v1208_v39 = vld [vmem:[#allocation8 + $0xb8] sm:$0xff]   ;;  %p1311_p13 = pnand %p1310_p5, %p1304_p2 }
  0xac   : > { %1060 = vmatprep.subr.bf16.mxu0 %v1188_v3  ;;  %1039 = vmatpush3.bf16.msra.mxu1 %v1197_v12  ;;  %v383_v20 = vld [vmem:[#allocation2 + $0xa] sm:$0xff] }
  0xad   : > { %1040 = vmatprep.subr.bf16.mxu1 %v1199_v14  ;;  %v386_v21 = vpack.c.bf16 %v383_v20, %v382_v19  ;;  %v1696_v26 = vld [vmem:[#allocation2 + $0x4] sm:$0xff]  ;;  %v1698_v27 = vld [vmem:[#allocation2 + $0xc] sm:$0xff]  ;;  %v600_v40 = vld [vmem:[#allocation2 + $0x14] sm:$0xff] }
  0xae   : > { %v602_v30 = vpack.c.bf16 %v1698_v27, %v1696_v26  ;;  %v384_v31 = vld [vmem:[#allocation2 + $0x12] sm:$0xff]  ;;  %v1206_v38 = vld [vmem:[#allocation8 + $0xb0] sm:$0xff]  }
  0xaf   : > { %1061 = vmatpush3.bf16.msra.mxu0 %v1188_v3  ;;  %1050 = vmatprep.mubr.bf16.mxu1 %v386_v21 }
  0xb0   : > { %1062 = vmatprep.subr.bf16.mxu0 %v1189_v7  ;;  %1041 = vmatpush3.bf16.msra.mxu1 %v1199_v14  ;;  %v385_v32 = vld [vmem:[#allocation2 + $0x1a] sm:$0xff] }
  0xb1   : > { %1042 = vmatprep.subr.bf16.mxu1 %v1201_v16  ;;  %v387_v34 = vpack.c.bf16 %v385_v32, %v384_v31  ;;  %v601_v41 = vld [vmem:[#allocation2 + $0x1c] sm:$0xff] }
  0xb2   : > { %v603_v42 = vpack.c.bf16 %v601_v41, %v600_v40 }
  0xb3   : > { %1063 = vmatpush3.bf16.msra.mxu0 %v1189_v7 }
  0xb4   : > { %1064 = vmatprep.subr.bf16.mxu0 %v1190_v13  ;;  %1043 = vmatpush3.bf16.msra.mxu1 %v1201_v16 }
  0xb5   : > { %1044 = vmatprep.subr.bf16.mxu1 %v1203_v18 }
  0xb7   : > { %1065 = vmatpush3.bf16.msra.mxu0 %v1190_v13 }
  0xb8   : > { %1066 = vmatprep.subr.bf16.mxu0 %v1191_v15  ;;  %1045 = vmatpush3.bf16.msra.mxu1 %v1203_v18 }
  0xb9   : > { %1046 = vmatprep.subr.bf16.mxu1 %v1205_v24 }
  0xbb   : > { %1067 = vmatpush3.bf16.msra.mxu0 %v1191_v15 }
  0xbc   : > { %1068 = vmatprep.subr.bf16.mxu0 %v1192_v17  ;;  %1047 = vmatpush3.bf16.msra.mxu1 %v1205_v24 }
  0xbd   : > { %1048 = vmatprep.subr.bf16.mxu1 %v1207_v29 }
  0xbf   : > { %1069 = vmatpush3.bf16.msra.mxu0 %v1192_v17 }
  0xc0   : > { %1074 = vmatprep.subr.bf16.mxu0 %v1194_v23  ;;  %1049 = vmatpush3.bf16.msra.mxu1 %v1207_v29 }
  0xc2   : > { %1071 = vmatmul.mubr.bf16.vlgmr.msra.gmra.mrb[0].mxu0 %v365_v25 }
  0xc3   : > { %1075 = vmatpush3.bf16.msra.mxu0 %v1194_v23  ;;  %1090 = vmatprep.mubr.bf16.mxu0 %v602_v30 }
  0xc4   : > { %1076 = vmatprep.subr.bf16.mxu0 %v1196_v28  ;;  %1051 = vmatmul.mubr.bf16.vlgmr.msra.gmra.mrb[0].mxu1 %v387_v34 }
  0xc7   : > { %1077 = vmatpush3.bf16.msra.mxu0 %v1196_v28 }
  0xc8   : > { %1078 = vmatprep.subr.bf16.mxu0 %v1198_v33 }
  0xcb   : > { %1079 = vmatpush3.bf16.msra.mxu0 %v1198_v33 }
  0xcc   : > { %1080 = vmatprep.subr.bf16.mxu0 %v1200_v35 }
  0xcf   : > { %1081 = vmatpush3.bf16.msra.mxu0 %v1200_v35 }
  0xd0   : > { %1082 = vmatprep.subr.bf16.mxu0 %v1202_v36 }
  0xd3   : > { %1083 = vmatpush3.bf16.msra.mxu0 %v1202_v36 }
  0xd4   : > { %1084 = vmatprep.subr.bf16.mxu0 %v1204_v37 }
  0xd7   : > { %1085 = vmatpush3.bf16.msra.mxu0 %v1204_v37 }
  0xd8   : > { %1086 = vmatprep.subr.bf16.mxu0 %v1206_v38 }
  0xdb   : > { %1087 = vmatpush3.bf16.msra.mxu0 %v1206_v38 }
  0xdc   : > { %1088 = vmatprep.subr.bf16.mxu0 %v1208_v39 }
  0xdf   : > { %1089 = vmatpush3.bf16.msra.mxu0 %v1208_v39 }
  0xe2   : > { %1091 = vmatmul.mubr.bf16.vlgmr.msra.gmra.mrb[0].mxu0 %v603_v42 }
 0x197   : > { %v1052_v43 = vpop.f32.mrb[0].mxu1 }
 0x198   : > { %v486_v44 = vpop.f32.mrb[1].mxu1 }
 0x199   : > { %v1053_v45 = vpop.f32.mrb[2].mxu1 }
 0x19a   : > { %v489_v46 = vpop.f32.mrb[3].mxu1 }
 0x1b5   : > { %v1092_v47 = vpop.f32.mrb[0].mxu0 }
 0x1b6   : > { %v1094_v49 = vadd.f32 %v1092_v47, %v1052_v43  ;;  %v702_v50 = vpop.f32.mrb[1].mxu0  ;;  %v987_v43 = vld [vmem:[%s1790_s4] ss:$0 sm:$0xff] }
 0x1b7   : > { %v1095_v51 = vadd.f32 %v702_v50, %v486_v44  ;;  %v1093_v52 = vpop.f32.mrb[2].mxu0 }
 0x1b8   : > { %v730_v53 = vadd.f32 %v1094_v49, %v986_v48  ;;  %v1096_v54 = vadd.f32 %v1093_v52, %v1053_v45  ;;  %v705_v55 = vpop.f32.mrb[3].mxu0 }
 0x1b9   : > { %v728_v56 = vadd.f32 %v1095_v51, %v986_v48  ;;  %v1097_v57 = vadd.f32 %v705_v55, %v489_v46  ;;  %v988_v46 = vld [vmem:[%s1791_s5] ss:$0 sm:$0xff] }
 0x1ba   : > { %v734_v58 = vmax.f32 %v730_v53, 0.0  ;;  %v731_v59 = vadd.f32 %v1096_v54, %v986_v48 }
 0x1bb   : > { %v732_v60 = vmax.f32 %v728_v56, 0.0  ;;  %v729_v61 = vadd.f32 %v1097_v57, %v986_v48 }
 0x1bc   : > { %v735_v62 = vmax.f32 %v731_v59, 0.0  ;;  %v1705_v63 = vadd.f32 %v734_v58, %v600_v40 }
 0x1bd   : > { %v733_v0 = vmax.f32 %v729_v61, 0.0  ;;  %v736_v1 = vadd.f32 %v732_v60, %v1696_v26 }
 0x1be   : > { %744 = vadd.xlane.f32.xlu1 %v1705_v63  ;;  %v1709_v2 = vadd.f32 %v735_v62, %v601_v41  ;;  %v754_v7 = vmul.f32 %v1705_v63, %v1705_v63 }
 0x1bf   : > { %740 = vadd.xlane.f32.xlu0 %v736_v1  ;;  %v737_v3 = vadd.f32 %v733_v0, %v1698_v27  ;;  %v752_v5 = vmul.f32 %v736_v1, %v736_v1 }
 0x1c0   : > { %v755_v6 = vmul.f32 %v1709_v2, %v1709_v2 }
 0x1c1   : > { %v753_v4 = vmul.f32 %v737_v3, %v737_v3 }
 0x1c2   : > { %746 = vadd.xlane.f32.xlu1 %v1709_v2 }
 0x1c3   : > { %742 = vadd.xlane.f32.xlu0 %v737_v3 }
 0x1c6   : > { %758 = vadd.xlane.f32.xlu1 %v753_v4 }
 0x1c7   : > { %756 = vadd.xlane.f32.xlu0 %v752_v5 }
 0x1ca   : > { %762 = vadd.xlane.f32.xlu1 %v755_v6 }
 0x1cb   : > { %760 = vadd.xlane.f32.xlu0 %v754_v7 }
 0x24b   : > { %v745_v8 = vpop.xlane.xlu1 %744 }
 0x24c   : > { %v741_v9 = vpop.xlane.xlu0 %740  ;;  %v750_v19 = vmul.f32 0.0078125, %v745_v8 }
 0x24d   : > { %v748_v12 = vmul.f32 0.0078125, %v741_v9 }
 0x24e   : > { %v770_v29 = vmul.f32 %v750_v19, %v750_v19  ;;  %v782_v51 = vsub.f32 %v1705_v63, %v750_v19 }
 0x24f   : > { %v747_v10 = vpop.xlane.xlu1 %746  ;;  %v768_v20 = vmul.f32 %v748_v12, %v748_v12  ;;  %v780_v42 = vsub.f32 %v736_v1, %v748_v12 }
 0x250   : > { %v743_v11 = vpop.xlane.xlu0 %742  ;;  %v751_v16 = vmul.f32 0.0078125, %v747_v10 }
 0x251   : > { %v749_v13 = vmul.f32 0.0078125, %v743_v11 }
 0x252   : > { %v771_v25 = vmul.f32 %v751_v16, %v751_v16  ;;  %v783_v48 = vsub.f32 %v1709_v2, %v751_v16 }
 0x253   : > { %v769_v14 = vmul.f32 %v749_v13, %v749_v13  ;;  %v759_v15 = vpop.xlane.xlu1 %758  ;;  %v781_v40 = vsub.f32 %v737_v3, %v749_v13 }
 0x254   : > { %v765_v17 = vmul.f32 0.0078125, %v759_v15  ;;  %v757_v18 = vpop.xlane.xlu0 %756 }
 0x255   : > { %v764_v21 = vmul.f32 0.0078125, %v757_v18 }
 0x256   : > { %v773_v22 = vsub.f32 %v765_v17, %v769_v14 }
 0x257   : > { %v772_v23 = vsub.f32 %v764_v21, %v768_v20  ;;  %v763_v24 = vpop.xlane.xlu1 %762 }
 0x258   : > { %v777_v26 = vmax.f32 %v773_v22, 0.0  ;;  %v767_v27 = vmul.f32 0.0078125, %v763_v24  ;;  %v761_v28 = vpop.xlane.xlu0 %760 }
 0x259   : > { %v776_v30 = vmax.f32 %v772_v23, 0.0  ;;  %v766_v31 = vmul.f32 0.0078125, %v761_v28 }
 0x25a   : > { %v785_v32 = vadd.f32 1e-05, %v777_v26  ;;  %v775_v33 = vsub.f32 %v767_v27, %v771_v25 }
 0x25b   : > { %v784_v34 = vadd.f32 1e-05, %v776_v30  ;;  %v774_v35 = vsub.f32 %v766_v31, %v770_v29 }
 0x25c   : > { %1209 = vrsqrt.f32 %v785_v32  ;;  %v779_v36 = vmax.f32 %v775_v33, 0.0 }
 0x25d   : > { %1211 = vrsqrt.f32 %v784_v34  ;;  %v778_v37 = vmax.f32 %v774_v35, 0.0 }
 0x25e   : > { %v787_v38 = vadd.f32 1e-05, %v779_v36 }
 0x25f   : > { %v786_v39 = vadd.f32 1e-05, %v778_v37 }
 0x260   : > { %1213 = vrsqrt.f32 %v787_v38 }
 0x261   : > { %1215 = vrsqrt.f32 %v786_v39 }
 0x266   : > { %v1210_v41 = vpop.eup %1209 }
 0x267   : > { %v1212_v44 = vpop.eup %1211  ;;  %v793_v45 = vmul.f32 %v1210_v41, %v781_v40 }
 0x268   : > { %v792_v47 = vmul.f32 %v1212_v44, %v780_v42 }
 0x269   : > { %v804_v49 = vmul.f32 %v987_v43, %v793_v45 }
 0x26a   : > { %v1214_v50 = vpop.eup %1213  ;;  %v803_v52 = vmul.f32 %v987_v43, %v792_v47 }
 0x26b   : > { %v1216_v53 = vpop.eup %1215  ;;  %v815_v54 = vadd.f32 %v988_v46, %v804_v49  ;;  %v795_v55 = vmul.f32 %v1214_v50, %v783_v48 }
 0x26c   : > { %v814_v56 = vadd.f32 %v988_v46, %v803_v52  ;;  %v794_v57 = vmul.f32 %v1216_v53, %v782_v51 }
 0x26d   : > { %819 = vst [vmem:[%s338_s7 + $0x8] sm:$0xff] %v815_v54  ;;  %v806_v58 = vmul.f32 %v987_v43, %v795_v55 }
 0x26e   : > { %818 = vst [vmem:[%s338_s7] sm:$0xff] %v814_v56  ;;  %v805_v59 = vmul.f32 %v987_v43, %v794_v57 }
 0x26f   : > { %v817_v60 = vadd.f32 %v988_v46, %v806_v58 }
 0x270   : > { %v816_v61 = vadd.f32 %v988_v46, %v805_v59 }
 0x271   : > { %821 = vst [vmem:[%s338_s7 + $0x18] sm:$0xff] %v817_v60 }
 0x272   : > { %820 = vst [vmem:[%s338_s7 + $0x10] sm:$0xff] %v816_v61 }
 0x273   : > { %1314 = shalt.err (!%p1311_p13)
}
 0x274   : > { %s1315_s15 = scalar_lea.hbm %s1731_s30, 512  ;;  %s1319_s18 = scalar_lea.hbm %s1792_s6, 1024 }
 0x275   : > { %p1316_p7 = scmp.ne.s32.totalorder %s1731_s30, %s1315_s15  ;;  %p1320_p8 = scmp.lt.u32.totalorder %s1731_s30, %s1792_s6 }
 0x276   : > { %p1321_p9 = scmp.lt.u32.totalorder %s1319_s18, %s1315_s15  ;;  %p1323_p4 = scmp.lt.u32.totalorder %s1315_s15, %s1731_s30 }
 0x277   : > { %p1317_p1 = pnand %p1316_p7, %p1832_p3 }
 0x278   : > { %p1322_p0 = por %p1321_p9, %p1320_p8 }
 0x279   : > { %p1318_p6 = pneg %p1317_p1 }
 0x27a   : > { %p1324_p10 = por %p1323_p4, %p1322_p0 }
 0x27c   : > { %p1325_p2 = pnand %p1324_p10, %p1318_p6 }
 0x27e   : > { %1328 = shalt.err (!%p1325_p2)
}
 0x27f   : > { %s1409_s20 = smov 128   ;;  %s1410_s8 = smov 8  }
 0x280   : > { %1109 = dma.vmem_to_hbm [thread:$0]  (%p1832_p3), %s1733_s17, 512, %s1731_s30, %s823_s28, %s1409_s20, %s1409_s20, %s1410_s8  }
 0x281 PF: > { %s1833_s0 = sld [smem:[#allocation17_spill]]  ;;  %s851_s7 = sand.u32 1, %s1387_s24  }
 0x282   : > { %p1835_p12 = scmp.ge.s32.totalorder %s1399_s27, 2  ;;  %s852_s21 = scalar_lea.sflag [#allocation5], %s851_s7 }
 0x287   : > { %p1834_p11 = scmp.ne.s32.totalorder %s1833_s0, 0 }
 0x289   : > { %p1116_p5 = pnand %p1835_p12, %p1834_p11 }
 0x28b   : > { %1370 = dma.done.wait (!%p1116_p5), %s852_s21, 512  }
 0x28c   : > { %1372 = vsyncadd (!%p1116_p5), %s852_s21, 4294966784  ;;  %s1836_s27 = sld [smem:[#allocation15_spill]]  ;;  %s1837_s12 = sld [smem:[#allocation18_spill]] }
 0x28d   : > { %s1838_s13 = sld [smem:[#allocation14_spill]]  ;;  %s1839_s26 = sld [smem:[#allocation16_spill]] }
 0x28e   : > { %s1840_s21 = smov %s1379_s22  ;;  %s1841_s22 = smov %s1383_s23 }
 0x28f   : > { %s1843_s24 = smov %s1391_s25 }
 0x292   : > { %p22_p3 = scmp.ge.s32.totalorder %s1836_s27, 4   ;;  %s1842_s23 = smov %s1837_s12 }
 0x293   : > { %s1844_s25 = smov %s1838_s13 }
 0x294   :  { %24 = sbr.rel (!%p22_p3) target bundleno = 12 (0xc), region = 106 }
 0x29b   :  { %857 = vsyncpa [#allocation4], 1 }
 0x29c   :  { %859 = vsyncpa [#allocation4 + $0x1], 1 }
 0x29d   :  { %860 = vsyncpa [#allocation7], 1 }
 0x29e   :  { %862 = vsyncpa [#allocation7 + $0x1], 1 }
 0x29f   :  { %863 = vsyncpa [#allocation5], 1 }
 0x2a0   :  { %865 = vsyncpa [#allocation5 + $0x1], 1 }

</bundles_post_ra>
